<compile_context>
chip_gen: v7x
topology: tpu7x:2x2x1
jax: 0.10.0
libtpu: 0.0.40
codegen_flags: <defaults>
</compile_context>

<pallas_src>
import functools

import jax
import jax.numpy as jnp
from jax.experimental import pallas as pl
from jax.experimental.pallas import tpu as pltpu

_LANE = 128
_SUBLANE = 8
# 8192 rows x 128 lanes x 4 B = 4 MiB per f32 input block; 2 inputs x 2 buffers
# = 16 MiB, covered by the explicit 32 MiB scoped-VMEM limit below.
_MAX_TILE_ROWS = 8192
_VMEM_LIMIT_BYTES = 32 * 1024 * 1024


def _rmse_kernel(p_ref, t_ref, sumsq_ref, cnt_ref, *,
                 tile_rows, half_blocks, valid_len, chan):
    c = pl.program_id(0)   # megacore half ("parallel")
    i = pl.program_id(1)   # reduction step ("arbitrary")

    # Init the resident per-core accumulators at the start of each core's sweep.
    @pl.when(i == 0)
    def _():
        sumsq_ref[...] = jnp.zeros_like(sumsq_ref)
        cnt_ref[...] = jnp.zeros_like(cnt_ref)

    tile_elems = tile_rows * _LANE
    blk = c * half_blocks + i        # logical (unclamped) block id
    block_start = blk * tile_elems   # element offset of this logical block

    p = p_ref[...].astype(jnp.float32)
    t = t_ref[...].astype(jnp.float32)

    if chan > 1:
        # Channel-0 selection.  Requires 128 % chan == 0 (checked in wrapper):
        # row and block offsets are then multiples of chan, so
        # global_idx % chan == lane % chan, a static lane-only pattern.
        lane = jax.lax.broadcasted_iota(jnp.int32, (tile_rows, _LANE), 1)
        chan_ok = (lane % chan) == 0
    else:
        chan_ok = None

    def _accumulate(extra_mask):
        mask = t == t                              # drop NaN targets
        if chan_ok is not None:
            mask = jnp.logical_and(mask, chan_ok)
        if extra_mask is not None:
            mask = jnp.logical_and(mask, extra_mask)
        diff = jnp.where(mask, p - t, jnp.float32(0.0))
        sumsq_ref[...] += jnp.sum(diff * diff, axis=0,
                                  keepdims=True).reshape(1, 1, _LANE)
        cnt_ref[...] += jnp.sum(mask.astype(jnp.int32), axis=0,
                                keepdims=True).reshape(1, 1, _LANE)

    is_full = (block_start + tile_elems) <= valid_len

    # Interior (full) blocks: no bounds mask, no iota for it.
    @pl.when(is_full)
    def _():
        _accumulate(None)

    # Ragged tail blocks, explicitly padded tails and clamped duplicate blocks:
    # mask by global element index.  Pallas' implicit padding of ragged blocks
    # may contain garbage (even NaN); jnp.where-before-square keeps it out.
    @pl.when(jnp.logical_not(is_full))
    def _():
        idx = (block_start
               + jax.lax.broadcasted_iota(jnp.int32, (tile_rows, _LANE), 0) * _LANE
               + jax.lax.broadcasted_iota(jnp.int32, (tile_rows, _LANE), 1))
        _accumulate(idx < valid_len)


def _rmse_pallas(p2d, t2d, valid_len, chan, max_tile_rows=_MAX_TILE_ROWS):
    rows, lanes = p2d.shape
    assert lanes == _LANE
    assert max_tile_rows % _SUBLANE == 0

    if rows <= max_tile_rows:
        tile_rows = rows            # full-dim block: always a legal block shape
    else:
        tile_rows = max_tile_rows   # multiple of 8

    num_blocks = pl.cdiv(rows, tile_rows)
    splits = 2 if num_blocks >= 2 else 1       # avoid a wasted second half
    half_blocks = pl.cdiv(num_blocks, splits)

    def in_map(c, i):
        blk = c * half_blocks + i
        # Clamp so no DMA starts out of bounds.  A clamped duplicate block has
        # the same block index as that core's previous step, so its input DMA
        # is elided by the pipeline; its contribution is index-masked in-kernel.
        return (jnp.minimum(blk, num_blocks - 1), 0)

    def out_map(c, i):
        return (c, 0, 0)

    kernel = functools.partial(
        _rmse_kernel,
        tile_rows=tile_rows,
        half_blocks=half_blocks,
        valid_len=valid_len,
        chan=chan,
    )

    sumsq_parts, cnt_parts = pl.pallas_call(
        kernel,
        grid=(splits, half_blocks),
        in_specs=[
            pl.BlockSpec((tile_rows, _LANE), in_map),
            pl.BlockSpec((tile_rows, _LANE), in_map),
        ],
        out_specs=(
            pl.BlockSpec((1, 1, _LANE), out_map),
            pl.BlockSpec((1, 1, _LANE), out_map),
        ),
        out_shape=(
            jax.ShapeDtypeStruct((splits, 1, _LANE), jnp.float32),
            jax.ShapeDtypeStruct((splits, 1, _LANE), jnp.int32),
        ),
        compiler_params=pltpu.CompilerParams(
            # TODO(synk): if xprof on v7x shows one TensorCore idle, switch the
            # leading axis to pltpu.CORE_PARALLEL (not portable to 1-TC chips).
            dimension_semantics=("parallel", "arbitrary"),
            vmem_limit_bytes=_VMEM_LIMIT_BYTES,
        ),
    )(p2d, t2d)

    cnt = jnp.sum(cnt_parts)                    # exact int32 count
    sumsq = jnp.sum(sumsq_parts)
    loss = jnp.sqrt(sumsq / cnt.astype(jnp.float32))
    return loss, cnt


def _as_kernel_dtype(x):
    x = jnp.asarray(x)
    if x.dtype == jnp.float32 or x.dtype == jnp.bfloat16:
        return x        # bf16 stays bf16: halves HBM bytes, upcast in-kernel
    return x.astype(jnp.float32)


def rmse_loss_ann(output, target, get_length=False,
                  max_tile_rows=_MAX_TILE_ROWS):
    """JAX/Pallas equivalent of RmseLossANN.forward."""
    output = _as_kernel_dtype(output)
    target = _as_kernel_dtype(target)

    if output.ndim == 2:
        chan = output.shape[1]
    elif output.ndim == 3:
        chan = output.shape[2]
    else:
        chan = None   # torch does [:, :, 0] on >3-D; channel dim is not last

    total = int(output.size)
    fused = (
        chan is not None
        and output.shape == target.shape
        and chan >= 1
        and _LANE % chan == 0
        and total > 0
        and total % _LANE == 0
    )

    if fused:
        # Zero-copy path: the reshapes below are free bitcasts of the raw
        # arrays; channel-0 selection happens in-kernel.
        rows = total // _LANE
        p2d = output.reshape(rows, _LANE)
        t2d = target.reshape(rows, _LANE)
        valid_len = total
        kchan = chan
    else:
        # Fallback: materialize the channel-0 slice (as the torch module does)
        # and pad by < 128 elements; pad values are index-masked in-kernel.
        if output.ndim == 2:
            p0, t0 = output[:, 0], target[:, 0]
        else:
            p0, t0 = output[:, :, 0], target[:, :, 0]
        p_flat = p0.reshape(-1)
        t_flat = t0.reshape(-1)
        n = p_flat.shape[0]
        pad = (-n) % _LANE
        if pad:
            p_flat = jnp.pad(p_flat, (0, pad))
            t_flat = jnp.pad(t_flat, (0, pad))
        rows = (n + pad) // _LANE
        p2d = p_flat.reshape(rows, _LANE)
        t2d = t_flat.reshape(rows, _LANE)
        valid_len = n
        kchan = 1

    loss, nday = _rmse_pallas(p2d, t2d, valid_len, kchan,
                              max_tile_rows=max_tile_rows)
    if not get_length:
        return loss
    return loss, nday


def _ref_loss(p0, t0):
    p0 = p0.reshape(-1).astype(jnp.float32)
    t0 = t0.reshape(-1).astype(jnp.float32)
    valid = t0 == t0
    loss = jnp.sqrt(
        jnp.sum(jnp.where(valid, (p0 - t0) ** 2, 0.0)) / jnp.sum(valid))
    return loss, jnp.sum(valid).astype(jnp.int32)


if __name__ == "__main__":
    key = jax.random.PRNGKey(0)
    k1, k2, k3 = jax.random.split(key, 3)

    # Case 1: 3-D (time=8, batch=8, channels=2) — fused zero-copy path,
    # single full block with in-kernel channel mask.
    T, B, C = 8, 8, 2
    out1 = jax.random.normal(k1, (T, B, C), dtype=jnp.float32)
    tgt1 = jax.random.normal(k2, (T, B, C), dtype=jnp.float32)
    nm1 = jax.random.bernoulli(k3, 0.25, (T, B))
    tgt1 = tgt1.at[:, :, 0].set(jnp.where(nm1, jnp.nan, tgt1[:, :, 0]))
    loss1, nday1 = rmse_loss_ann(out1, tgt1, get_length=True)
    loss1 = jax.block_until_ready(loss1)
    nday1 = jax.block_until_ready(nday1)
    ref1, refn1 = _ref_loss(out1[:, :, 0], tgt1[:, :, 0])
    assert jnp.allclose(loss1, ref1, rtol=1e-5, atol=1e-6), (loss1, ref1)
    assert int(nday1) == int(refn1), (nday1, refn1)

    # Case 2: 3-D (17, 64, 2) with a small tile override — exercises multiple
    # row tiles, the two-half "parallel" split, an odd block count, the ragged
    # last block and the clamped duplicate block.
    T2, B2 = 17, 64
    out2 = jax.random.normal(k1, (T2, B2, C), dtype=jnp.float32)
    tgt2 = jax.random.normal(k2, (T2, B2, C), dtype=jnp.float32)
    nm2 = jax.random.bernoulli(k3, 0.1, (T2, B2))
    tgt2 = tgt2.at[:, :, 0].set(jnp.where(nm2, jnp.nan, tgt2[:, :, 0]))
    loss2, nday2 = rmse_loss_ann(out2, tgt2, get_length=True, max_tile_rows=8)
    loss2 = jax.block_until_ready(loss2)
    nday2 = jax.block_until_ready(nday2)
    ref2, refn2 = _ref_loss(out2[:, :, 0], tgt2[:, :, 0])
    assert jnp.allclose(loss2, ref2, rtol=1e-5, atol=1e-6), (loss2, ref2)
    assert int(nday2) == int(refn2), (nday2, refn2)

    # Case 3: 2-D (N=10, C=3) — fallback slice + tiny pad path (128 % 3 != 0).
    out3 = jax.random.normal(k1, (10, 3), dtype=jnp.float32)
    tgt3 = jax.random.normal(k2, (10, 3), dtype=jnp.float32)
    tgt3 = tgt3.at[3, 0].set(jnp.nan)
    loss3 = jax.block_until_ready(rmse_loss_ann(out3, tgt3))
    ref3, _ = _ref_loss(out3[:, 0], tgt3[:, 0])
    assert jnp.allclose(loss3, ref3, rtol=1e-5, atol=1e-6), (loss3, ref3)

    # Case 4: bf16 inputs (8, 16, 2) — bf16 DMA, in-kernel upcast, fused path.
    out4 = jax.random.normal(k1, (8, 16, C), dtype=jnp.float32).astype(jnp.bfloat16)
    tgt4 = jax.random.normal(k2, (8, 16, C), dtype=jnp.float32).astype(jnp.bfloat16)
    nm4 = jax.random.bernoulli(k3, 0.2, (8, 16))
    tgt4 = tgt4.at[:, :, 0].set(
        jnp.where(nm4, jnp.bfloat16(jnp.nan), tgt4[:, :, 0]))
    loss4, nday4 = rmse_loss_ann(out4, tgt4, get_length=True)
    loss4 = jax.block_until_ready(loss4)
    nday4 = jax.block_until_ready(nday4)
    ref4, refn4 = _ref_loss(out4[:, :, 0], tgt4[:, :, 0])
    assert jnp.allclose(loss4, ref4, rtol=1e-5, atol=1e-6), (loss4, ref4)
    assert int(nday4) == int(refn4), (nday4, refn4)

    print("KERNEL_OK")
</pallas_src>

<mosaic_0001>
module attributes {stable_mosaic.version = 11 : i64} {
  func.func @_rmse_kernel(%arg0: i32, %arg1: i32, %arg2: memref<1x128xf32, #tpu.memory_space<vmem>>, %arg3: memref<1x128xf32, #tpu.memory_space<vmem>>, %arg4: memref<1x1x128xf32, #tpu.memory_space<vmem>>, %arg5: memref<1x1x128xi32, #tpu.memory_space<vmem>>) attributes {dimension_semantics = [#tpu.dimension_semantics<parallel>, #tpu.dimension_semantics<arbitrary>], iteration_bounds = array<i64: 1, 1>, scalar_prefetch = 0 : i64, scratch_operands = 0 : i64, tpu.core_type = #tpu.core_type<tc>, window_params = [{transform_indices = @transform_0, window_bounds = array<i64: 1, 128>}, {transform_indices = @transform_1, window_bounds = array<i64: 1, 128>}, {transform_indices = @transform_2, window_bounds = array<i64: 1, 1, 128>}, {transform_indices = @transform_3, window_bounds = array<i64: 1, 1, 128>}]} {
    %c0_i32 = arith.constant 0 : i32
    %0 = arith.cmpi eq, %arg1, %c0_i32 : i32
    %1 = arith.extui %0 : i1 to i32
    %c0_i32_0 = arith.constant 0 : i32
    %2 = arith.cmpi ne, %1, %c0_i32_0 : i32
    scf.if %2 {
      %cst = arith.constant 0.000000e+00 : f32
      %34 = vector.broadcast %cst : f32 to vector<1x1x128xf32>
      %c0_14 = arith.constant 0 : index
      %c0_15 = arith.constant 0 : index
      %c0_16 = arith.constant 0 : index
      %35 = vector.load %arg4[%c0_14, %c0_15, %c0_16] : memref<1x1x128xf32, #tpu.memory_space<vmem>>, vector<1x1x128xf32>
      tpu.vector_store %arg4[%c0_14, %c0_15, %c0_16], %34 {strides = array<i32>} : memref<1x1x128xf32, #tpu.memory_space<vmem>>, vector<1x1x128xf32>,
      %c0_i32_17 = arith.constant 0 : i32
      %36 = vector.broadcast %c0_i32_17 : i32 to vector<1x1x128xi32>
      %c0_18 = arith.constant 0 : index
      %c0_19 = arith.constant 0 : index
      %c0_20 = arith.constant 0 : index
      %37 = vector.load %arg5[%c0_18, %c0_19, %c0_20] : memref<1x1x128xi32, #tpu.memory_space<vmem>>, vector<1x1x128xi32>
      tpu.vector_store %arg5[%c0_18, %c0_19, %c0_20], %36 {strides = array<i32>} : memref<1x1x128xi32, #tpu.memory_space<vmem>>, vector<1x1x128xi32>,
    } else {
    }
    %c1_i32 = arith.constant 1 : i32
    %3 = arith.muli %arg0, %c1_i32 : i32
    %4 = arith.addi %3, %arg1 : i32
    %c128_i32 = arith.constant 128 : i32
    %5 = arith.muli %4, %c128_i32 : i32
    %c0 = arith.constant 0 : index
    %c0_1 = arith.constant 0 : index
    %6 = vector.load %arg2[%c0, %c0_1] : memref<1x128xf32, #tpu.memory_space<vmem>>, vector<1x128xf32>
    %c0_2 = arith.constant 0 : index
    %c0_3 = arith.constant 0 : index
    %7 = vector.load %arg3[%c0_2, %c0_3] : memref<1x128xf32, #tpu.memory_space<vmem>>, vector<1x128xf32>
    %8 = tpu.iota {dimensions = array<i32: 1>} : vector<1x128xi32>
    %c2_i32 = arith.constant 2 : i32
    %c0_i32_4 = arith.constant 0 : i32
    %9 = arith.cmpi eq, %c2_i32, %c0_i32_4 : i32
    %c1_i32_5 = arith.constant 1 : i32
    %10 = arith.select %9, %c1_i32_5, %c2_i32 : i32
    %11 = vector.broadcast %10 : i32 to vector<1x128xi32>
    %12 = arith.remsi %8, %11 : vector<1x128xi32>
    %c0_i32_6 = arith.constant 0 : i32
    %13 = vector.broadcast %c0_i32_6 : i32 to vector<1x128xi32>
    %14 = arith.cmpi ne, %12, %13 : vector<1x128xi32>
    %c0_i32_7 = arith.constant 0 : i32
    %15 = vector.broadcast %c0_i32_7 : i32 to vector<1x128xi32>
    %16 = arith.cmpi slt, %12, %15 : vector<1x128xi32>
    %c0_i32_8 = arith.constant 0 : i32
    %17 = arith.cmpi slt, %10, %c0_i32_8 : i32
    %18 = vector.broadcast %17 : i1 to vector<1x128xi1>
    %19 = vector.broadcast %18 : vector<1x128xi1> to vector<1x128xi1>
    %20 = arith.xori %16, %19 : vector<1x128xi1>
    %21 = arith.andi %20, %14 : vector<1x128xi1>
    %22 = vector.broadcast %10 : i32 to vector<1x128xi32>
    %23 = arith.addi %12, %22 : vector<1x128xi32>
    %24 = arith.select %21, %23, %12 : vector<1x128xi1>, vector<1x128xi32>
    %c0_i32_9 = arith.constant 0 : i32
    %25 = vector.broadcast %c0_i32_9 : i32 to vector<1x128xi32>
    %26 = arith.cmpi eq, %24, %25 : vector<1x128xi32>
    %c128_i32_10 = arith.constant 128 : i32
    %27 = arith.addi %5, %c128_i32_10 : i32
    %c128_i32_11 = arith.constant 128 : i32
    %28 = arith.cmpi sle, %27, %c128_i32_11 : i32
    %29 = arith.extui %28 : i1 to i32
    %c0_i32_12 = arith.constant 0 : i32
    %30 = arith.cmpi ne, %29, %c0_i32_12 : i32
    scf.if %30 {
      %34 = arith.cmpf oeq, %7, %7 : vector<1x128xf32>
      %35 = arith.andi %34, %26 : vector<1x128xi1>
      %36 = arith.subf %6, %7 : vector<1x128xf32>
      %cst = arith.constant 0.000000e+00 : f32
      %37 = vector.broadcast %cst : f32 to vector<1x128xf32>
      %38 = arith.select %35, %36, %37 : vector<1x128xi1>, vector<1x128xf32>
      %c0_14 = arith.constant 0 : index
      %c0_15 = arith.constant 0 : index
      %c0_16 = arith.constant 0 : index
      %39 = vector.load %arg4[%c0_14, %c0_15, %c0_16] : memref<1x1x128xf32, #tpu.memory_space<vmem>>, vector<1x1x128xf32>
      %40 = arith.mulf %38, %38 : vector<1x128xf32>
      %cst_17 = arith.constant dense<0.000000e+00> : vector<128xf32>
      %41 = vector.multi_reduction <add>, %40, %cst_17 [0] : vector<1x128xf32> to vector<128xf32>
      %42 = vector.shape_cast %41 : vector<128xf32> to vector<1x128xf32>
      %43 = vector.shape_cast %42 : vector<1x128xf32> to vector<1x1x128xf32>
      %44 = arith.addf %39, %43 : vector<1x1x128xf32>
      %c0_18 = arith.constant 0 : index
      %c0_19 = arith.constant 0 : index
      %c0_20 = arith.constant 0 : index
      %45 = vector.load %arg4[%c0_18, %c0_19, %c0_20] : memref<1x1x128xf32, #tpu.memory_space<vmem>>, vector<1x1x128xf32>
      tpu.vector_store %arg4[%c0_18, %c0_19, %c0_20], %44 {strides = array<i32>} : memref<1x1x128xf32, #tpu.memory_space<vmem>>, vector<1x1x128xf32>,
      %c0_21 = arith.constant 0 : index
      %c0_22 = arith.constant 0 : index
      %c0_23 = arith.constant 0 : index
      %46 = vector.load %arg5[%c0_21, %c0_22, %c0_23] : memref<1x1x128xi32, #tpu.memory_space<vmem>>, vector<1x1x128xi32>
      %47 = arith.extui %35 : vector<1x128xi1> to vector<1x128xi32>
      %cst_24 = arith.constant dense<0> : vector<128xi32>
      %48 = vector.multi_reduction <add>, %47, %cst_24 [0] : vector<1x128xi32> to vector<128xi32>
      %49 = vector.shape_cast %48 : vector<128xi32> to vector<1x128xi32>
      %50 = vector.shape_cast %49 : vector<1x128xi32> to vector<1x1x128xi32>
      %51 = arith.addi %46, %50 : vector<1x1x128xi32>
      %c0_25 = arith.constant 0 : index
      %c0_26 = arith.constant 0 : index
      %c0_27 = arith.constant 0 : index
      %52 = vector.load %arg5[%c0_25, %c0_26, %c0_27] : memref<1x1x128xi32, #tpu.memory_space<vmem>>, vector<1x1x128xi32>
      tpu.vector_store %arg5[%c0_25, %c0_26, %c0_27], %51 {strides = array<i32>} : memref<1x1x128xi32, #tpu.memory_space<vmem>>, vector<1x1x128xi32>,
    } else {
    }
    %true = arith.constant true
    %31 = arith.xori %28, %true : i1
    %32 = arith.extui %31 : i1 to i32
    %c0_i32_13 = arith.constant 0 : i32
    %33 = arith.cmpi ne, %32, %c0_i32_13 : i32
    scf.if %33 {
      %34 = tpu.iota {dimensions = array<i32: 0>} : vector<1x128xi32>
      %c128_i32_14 = arith.constant 128 : i32
      %35 = vector.broadcast %c128_i32_14 : i32 to vector<1x128xi32>
      %36 = arith.muli %34, %35 : vector<1x128xi32>
      %37 = vector.broadcast %5 : i32 to vector<1x128xi32>
      %38 = arith.addi %37, %36 : vector<1x128xi32>
      %39 = tpu.iota {dimensions = array<i32: 1>} : vector<1x128xi32>
      %40 = arith.addi %38, %39 : vector<1x128xi32>
      %c128_i32_15 = arith.constant 128 : i32
      %41 = vector.broadcast %c128_i32_15 : i32 to vector<1x128xi32>
      %42 = arith.cmpi slt, %40, %41 : vector<1x128xi32>
      %43 = arith.cmpf oeq, %7, %7 : vector<1x128xf32>
      %44 = arith.andi %43, %26 : vector<1x128xi1>
      %45 = arith.andi %44, %42 : vector<1x128xi1>
      %46 = arith.subf %6, %7 : vector<1x128xf32>
      %cst = arith.constant 0.000000e+00 : f32
      %47 = vector.broadcast %cst : f32 to vector<1x128xf32>
      %48 = arith.select %45, %46, %47 : vector<1x128xi1>, vector<1x128xf32>
      %c0_16 = arith.constant 0 : index
      %c0_17 = arith.constant 0 : index
      %c0_18 = arith.constant 0 : index
      %49 = vector.load %arg4[%c0_16, %c0_17, %c0_18] : memref<1x1x128xf32, #tpu.memory_space<vmem>>, vector<1x1x128xf32>
      %50 = arith.mulf %48, %48 : vector<1x128xf32>
      %cst_19 = arith.constant dense<0.000000e+00> : vector<128xf32>
      %51 = vector.multi_reduction <add>, %50, %cst_19 [0] : vector<1x128xf32> to vector<128xf32>
      %52 = vector.shape_cast %51 : vector<128xf32> to vector<1x128xf32>
      %53 = vector.shape_cast %52 : vector<1x128xf32> to vector<1x1x128xf32>
      %54 = arith.addf %49, %53 : vector<1x1x128xf32>
      %c0_20 = arith.constant 0 : index
      %c0_21 = arith.constant 0 : index
      %c0_22 = arith.constant 0 : index
      %55 = vector.load %arg4[%c0_20, %c0_21, %c0_22] : memref<1x1x128xf32, #tpu.memory_space<vmem>>, vector<1x1x128xf32>
      tpu.vector_store %arg4[%c0_20, %c0_21, %c0_22], %54 {strides = array<i32>} : memref<1x1x128xf32, #tpu.memory_space<vmem>>, vector<1x1x128xf32>,
      %c0_23 = arith.constant 0 : index
      %c0_24 = arith.constant 0 : index
      %c0_25 = arith.constant 0 : index
      %56 = vector.load %arg5[%c0_23, %c0_24, %c0_25] : memref<1x1x128xi32, #tpu.memory_space<vmem>>, vector<1x1x128xi32>
      %57 = arith.extui %45 : vector<1x128xi1> to vector<1x128xi32>
      %cst_26 = arith.constant dense<0> : vector<128xi32>
      %58 = vector.multi_reduction <add>, %57, %cst_26 [0] : vector<1x128xi32> to vector<128xi32>
      %59 = vector.shape_cast %58 : vector<128xi32> to vector<1x128xi32>
      %60 = vector.shape_cast %59 : vector<1x128xi32> to vector<1x1x128xi32>
      %61 = arith.addi %56, %60 : vector<1x1x128xi32>
      %c0_27 = arith.constant 0 : index
      %c0_28 = arith.constant 0 : index
      %c0_29 = arith.constant 0 : index
      %62 = vector.load %arg5[%c0_27, %c0_28, %c0_29] : memref<1x1x128xi32, #tpu.memory_space<vmem>>, vector<1x1x128xi32>
      tpu.vector_store %arg5[%c0_27, %c0_28, %c0_29], %61 {strides = array<i32>} : memref<1x1x128xi32, #tpu.memory_space<vmem>>, vector<1x1x128xi32>,
    } else {
    }
    return
  }
  func.func @transform_0(%arg0: i32, %arg1: i32) -> (i32, i32) {
    %c1_i32 = arith.constant 1 : i32
    %0 = arith.muli %arg0, %c1_i32 : i32
    %1 = arith.addi %0, %arg1 : i32
    %c0_i32 = arith.constant 0 : i32
    %2 = arith.minsi %1, %c0_i32 : i32
    %c0_i32_0 = arith.constant 0 : i32
    %c0_i32_1 = arith.constant 0 : i32
    return %2, %c0_i32_0 : i32, i32
  }
  func.func @transform_1(%arg0: i32, %arg1: i32) -> (i32, i32) {
    %c1_i32 = arith.constant 1 : i32
    %0 = arith.muli %arg0, %c1_i32 : i32
    %1 = arith.addi %0, %arg1 : i32
    %c0_i32 = arith.constant 0 : i32
    %2 = arith.minsi %1, %c0_i32 : i32
    %c0_i32_0 = arith.constant 0 : i32
    %c0_i32_1 = arith.constant 0 : i32
    return %2, %c0_i32_0 : i32, i32
  }
  func.func @transform_2(%arg0: i32, %arg1: i32) -> (i32, i32, i32) {
    %c0_i32 = arith.constant 0 : i32
    %c0_i32_0 = arith.constant 0 : i32
    %c0_i32_1 = arith.constant 0 : i32
    return %arg0, %c0_i32, %c0_i32_0 : i32, i32, i32
  }
  func.func @transform_3(%arg0: i32, %arg1: i32) -> (i32, i32, i32) {
    %c0_i32 = arith.constant 0 : i32
    %c0_i32_0 = arith.constant 0 : i32
    %c0_i32_1 = arith.constant 0 : i32
    return %arg0, %c0_i32, %c0_i32_0 : i32, i32, i32
  }
}

</mosaic_0001>

<bundles_post_ra>
// kernel: tpu_custom_call.1
= control target key start
LH: loop header
LB: loop body
LE: loop exit
PB: predicated region body
PF: predicated region fallthrough
CT: control target
= control target key end

     0   :  { %9 = vsyncpa [#allocation3], 0  ;;  %s310_s0 = inlined_call_operand.hbm [shape: f32[1,128], index: 0, kind: input, shape index: {}]   ;;  %s311_s1 = inlined_call_operand.vmem [shape: f32[1,128], index: 1, kind: input, shape index: {}]   ;;  %s312_s2 = inlined_call_operand.hbm [shape: f32[1,1,128], index: 2, kind: output, shape index: {0}]   ;;  %s313_s3 = inlined_call_operand.hbm [shape: s32[1,1,128], index: 3, kind: output, shape index: {1}]  }
   0x1   :  { %10 = vsyncpa [#allocation4], 0 }
   0x2   :  { %11 = vsyncpa [#allocation7], 0  ;;  %s238_s12 = smov [#allocation2]   ;;  %s166_s16 = scalar_lea.hbm %s310_s0, 16 }
   0x3   :  { %s23_s13 = sshll.u32 %s238_s12, 4  ;;  %p167_p0 = scmp.ne.s32.totalorder %s310_s0, %s166_s16  ;;  %s24_s13 = int_to_ptr.vmem [resolvable:$true] %s23_s13 }
   0x4   :  { %p170_p1 = scmp.lt.u32.totalorder %s166_s16, %s310_s0 }
   0x6   :  { %p172_p2 = pnand %p170_p1, %p167_p0 }
   0x8   :  { %175 = shalt.err (!%p172_p2)
}
   0x9   :  { %s176_s21 = scalar_lea.vmem %s24_s13, 16  ;;  %s180_s22 = scalar_lea.vmem %s24_s13, 32 }
   0xa   :  { %p177_p3 = scmp.ne.s32.totalorder %s24_s13, %s176_s21  ;;  %p181_p4 = scmp.lt.s32.totalorder %s24_s13, %s24_s13 }
   0xb   :  { %p182_p5 = scmp.lt.s32.totalorder %s180_s22, %s176_s21 }
   0xd   :  { %p183_p6 = por %p182_p5, %p181_p4 }
   0xf   :  { %p184_p7 = pnand %p183_p6, %p177_p3 }
  0x11   :  { %187 = shalt.err (!%p184_p7)
}
  0x12   :  { %26 = dma.hbm_to_vmem [thread:$0]  %s310_s0, 16, %s24_s13, [#allocation3]  }
  0x13   :  { %232 = dma.done.wait [#allocation3], 16  }
  0x14   :  { %233 = vsyncadd [#allocation3], 4294967280  ;;  %v69_v0 = vlaneseq  ;;  %v239_v1 = vmov 0.0   ;;  %v240_v2 = vmov 0   ;;  %v67_v5 = vld [vmem:[#allocation2] sm:$0x1] }
  0x15   :  { %63 = vst [vmem:[#allocation5] sm:$0x1] %v239_v1  ;;  %64 = vst [vmem:[#allocation6] sm:$0x1] %v240_v2  ;;  %v68_v6 = vld [vmem:[%s311_s1] sm:$0x1] }
  0x16   :  { %v70_v3 = vand.u32 127, %v69_v0  ;;  %vm89_vm1 = vcmp.eq.f32.partialorder %v68_v6, %v68_v6  ;;  %v91_v7 = vsub.f32 %v67_v5, %v68_v6  ;;  %s241_s27 = smov [#allocation6]   ;;  %s242_s28 = smov [#allocation5]  }
  0x17   :  { %s143_s0 = sshll.u32 %s241_s27, 4  ;;  %s133_s29 = sshll.u32 %s242_s28, 4  ;;  %s144_s0 = int_to_ptr.vmem [resolvable:$true] %s143_s0  ;;  %s278_s29 = int_to_ptr.vmem [resolvable:$true] %s133_s29 }
  0x18   :  { %v75_v4 = vand.u32 1, %v70_v3  ;;  %s188_s30 = scalar_lea.vmem %s144_s0, 16  ;;  %s192_s1 = scalar_lea.vmem %s144_s0, 32 }
  0x19   :  { %p189_p8 = scmp.ne.s32.totalorder %s144_s0, %s188_s30  ;;  %p193_p9 = scmp.lt.s32.totalorder %s144_s0, %s144_s0 }
  0x1a   :  { %vm83_vm0 = vcmp.eq.s32.totalorder %v75_v4, 0  ;;  %p194_p10 = scmp.lt.s32.totalorder %s192_s1, %s188_s30 }
  0x1b   :  { %vm90_vm2 = vmand %vm89_vm1, %vm83_vm0 }
  0x1c   :  { %v98_v8 = vld [vmem:[#allocation6] sm:$0x1]  ;;  %v92_v9 = vsel %vm90_vm2, %v91_v7, 0.0  ;;  %v99_v10 = vsel %vm90_vm2, 1, %v240_v2  ;;  %v93_v11 = vld [vmem:[#allocation5] sm:$0x1]  ;;  %p195_p11 = por %p194_p10, %p193_p9 }
  0x1d   :  { %v94_v12 = vmul.f32 %v92_v9, %v92_v9  ;;  %v100_v13 = vadd.s32 %v99_v10, %v98_v8 }
  0x1e   :  { %p196_p12 = pnand %p195_p11, %p189_p8 }
  0x1f   :  { %101 = vst [vmem:[#allocation6] sm:$0x1] %v100_v13  ;;  %v96_v14 = vadd.f32 %v94_v12, %v93_v11 }
  0x20   :  { %199 = shalt.err (!%p196_p12)
}
  0x21   :  { %s200_s6 = scalar_lea.hbm %s313_s3, 16 }
  0x22   :  { %p201_p13 = scmp.ne.s32.totalorder %s313_s3, %s200_s6  ;;  %p204_p0 = scmp.lt.u32.totalorder %s200_s6, %s313_s3 }
  0x24   :  { %p206_p1 = pnand %p204_p0, %p201_p13 }
  0x26   :  { %209 = shalt.err (!%p206_p1)
}
  0x27   :  { %146 = dma.vmem_to_hbm [thread:$0]  %s144_s0, 16, %s313_s3, [#allocation7]   ;;  %97 = vst [vmem:[#allocation5] sm:$0x1] %v96_v14 }
  0x28   :  { %s210_s13 = scalar_lea.vmem %s278_s29, 16  ;;  %s214_s14 = scalar_lea.vmem %s278_s29, 32 }
  0x29   :  { %p211_p2 = scmp.ne.s32.totalorder %s278_s29, %s210_s13  ;;  %p215_p3 = scmp.lt.s32.totalorder %s278_s29, %s278_s29 }
  0x2a   :  { %p216_p4 = scmp.lt.s32.totalorder %s214_s14, %s210_s13 }
  0x2c   :  { %p217_p5 = por %p216_p4, %p215_p3 }
  0x2e   :  { %p218_p6 = pnand %p217_p5, %p211_p2 }
  0x30   :  { %221 = shalt.err (!%p218_p6)
}
  0x31   :  { %s222_s17 = scalar_lea.hbm %s312_s2, 16 }
  0x32   :  { %p223_p7 = scmp.ne.s32.totalorder %s312_s2, %s222_s17  ;;  %p226_p8 = scmp.lt.u32.totalorder %s222_s17, %s312_s2 }
  0x34   :  { %p228_p9 = pnand %p226_p8, %p223_p7 }
  0x36   :  { %231 = shalt.err (!%p228_p9)
}
  0x37   :  { %136 = dma.vmem_to_hbm [thread:$0]  %s278_s29, 16, %s312_s2, [#allocation4]  }
  0x38   :  { %234 = dma.done.wait [#allocation4], 16  }
  0x39   :  { %235 = vsyncadd [#allocation4], 4294967280 }
  0x3a   :  { %236 = dma.done.wait [#allocation7], 16  }
  0x3b   :  { %237 = vsyncadd [#allocation7], 4294967280 }
  0x3c   :  { %153 = vsyncpa [#allocation3], 1 }
  0x3d   :  { %154 = vsyncpa [#allocation4], 1 }
  0x3e   :  { %155 = vsyncpa [#allocation7], 1 }

</bundles_post_ra>
